<compile_context>
chip_gen: v7x
topology: tpu7x:2x2x1
jax: 0.10.0
libtpu: 0.0.40
codegen_flags: <defaults>
</compile_context>

<pallas_src>
import math

import jax
import jax.numpy as jnp
from jax.experimental import pallas as pl
from jax.experimental.pallas import tpu as pltpu

LANES = 128
HIDDEN = 10
TILE_ROWS = 8192           # 4 MiB f32 block; 2 bufs x (in + out) = 16 MiB VMEM


def mlp_kernel(params_ref, x_ref, o_ref):
    # params_ref: SMEM (22,) f32 = [A, C, r_0..r_9, d_0..d_9]
    # x_ref / o_ref: (tile_rows, 128) f32 lane-dense views of the batch.
    x = x_ref[...]
    acc = x * params_ref[0] + params_ref[1]                  # A*x + C
    # Static 10x unroll: (sub, abs, mul, add) per hidden unit, all on the VPU.
    for j in range(HIDDEN):
        acc = acc + params_ref[2 + HIDDEN + j] * jnp.abs(x - params_ref[2 + j])
    o_ref[...] = acc


def pack_params(w1, b1, w2, b2):
    """Fold torch-convention weights (w1 (10,1), b1 (10,), w2 (1,10), b2 (1,))
    into the 22 scalars of  y = C + A*x + sum_j d_j * |x - r_j|."""
    w1 = w1.reshape(-1).astype(jnp.float32)
    b1 = b1.reshape(-1).astype(jnp.float32)
    w2 = w2.reshape(-1).astype(jnp.float32)
    b2 = b2.reshape(-1).astype(jnp.float32)
    nz = w1 != 0.0
    a = 0.5 * jnp.sum(w2 * w1)
    c = (b2[0] + 0.5 * jnp.sum(w2 * b1)
         + jnp.sum(jnp.where(nz, 0.0, 0.5 * w2 * jnp.abs(b1))))   # dead units
    r = jnp.where(nz, -b1 / jnp.where(nz, w1, 1.0), 0.0)
    d = jnp.where(nz, 0.5 * jnp.abs(w1) * w2, 0.0)
    return jnp.concatenate([jnp.stack([a, c]), r, d])             # (22,)


def _round_up(v, m):
    return ((v + m - 1) // m) * m


@jax.jit
def net_forward_packed(x, packed):
    """x: (N, 1) f32, packed: (22,) f32  ->  (N, 1) f32."""
    n = x.shape[0]
    rows = pl.cdiv(n, LANES)
    padded_rows = _round_up(rows, 8)        # sublane alignment only
    padded_n = padded_rows * LANES          # minimal pad (24 elems for N=1000)
    x2d = jnp.pad(x.reshape(-1), (0, padded_n - n)).reshape(padded_rows, LANES)

    tile_rows = min(TILE_ROWS, padded_rows)
    grid = pl.cdiv(padded_rows, tile_rows)  # last block may be partial

    cost = pl.CostEstimate(
        flops=(2 + 4 * HIDDEN) * padded_n,  # A*x+C plus 10x (sub,abs,mul,add)
        transcendentals=0,
        bytes_accessed=2 * 4 * padded_n,    # 4B read + 4B write per element
    )

    y2d = pl.pallas_call(
        mlp_kernel,
        out_shape=jax.ShapeDtypeStruct((padded_rows, LANES), jnp.float32),
        grid_spec=pltpu.PrefetchScalarGridSpec(
            num_scalar_prefetch=1,          # packed scalars -> SMEM
            grid=(grid,),
            in_specs=[pl.BlockSpec((tile_rows, LANES), lambda i, p: (i, 0))],
            out_specs=pl.BlockSpec((tile_rows, LANES), lambda i, p: (i, 0)),
        ),
        compiler_params=pltpu.CompilerParams(
            dimension_semantics=("parallel",),
        ),
        cost_estimate=cost,
    )(packed, x2d)

    # Drop padding, restore (N, 1).
    return y2d.reshape(-1)[:n].reshape(n, 1)


def net_forward(x, w1, b1, w2, b2):
    return net_forward_packed(x, pack_params(w1, b1, w2, b2))


def init_params(key):
    # torch.nn.Linear default init: U(-1/sqrt(fan_in), 1/sqrt(fan_in)).
    k1, k2, k3, k4 = jax.random.split(key, 4)
    bound1 = 1.0                       # fan_in = 1
    bound2 = 1.0 / math.sqrt(10.0)     # fan_in = 10
    w1 = jax.random.uniform(k1, (HIDDEN, 1), jnp.float32, -bound1, bound1)
    b1 = jax.random.uniform(k2, (HIDDEN,), jnp.float32, -bound1, bound1)
    w2 = jax.random.uniform(k3, (1, HIDDEN), jnp.float32, -bound2, bound2)
    b2 = jax.random.uniform(k4, (1,), jnp.float32, -bound2, bound2)
    return w1, b1, w2, b2


if __name__ == "__main__":
    key = jax.random.PRNGKey(0)
    w1, b1, w2, b2 = init_params(key)

    # Matches the module: torch.unsqueeze(torch.linspace(-1, 1, 1000), dim=1).
    n = 1000
    x = jnp.linspace(-1.0, 1.0, n, dtype=jnp.float32).reshape(n, 1)

    packed = pack_params(w1, b1, w2, b2)   # hoisted out of the per-call path
    y = net_forward_packed(x, packed)
    jax.block_until_ready(y)

    # Pure-JAX reference (torch Linear semantics: y = x @ W.T + b).
    h_ref = jnp.maximum(x @ w1.T + b1, 0.0)
    y_ref = h_ref @ w2.T + b2
    assert y.shape == (n, 1)
    assert jnp.allclose(y, y_ref, atol=1e-5, rtol=1e-5)

    print("KERNEL_OK")
</pallas_src>

<mosaic_0001>
module attributes {stable_mosaic.version = 11 : i64} {
  func.func @mlp_kernel(%arg0: i32, %arg1: memref<22xf32, #tpu.memory_space<smem>>, %arg2: memref<8x128xf32, #tpu.memory_space<vmem>>, %arg3: memref<8x128xf32, #tpu.memory_space<vmem>>) attributes {dimension_semantics = [#tpu.dimension_semantics<parallel>], iteration_bounds = array<i64: 1>, scalar_prefetch = 1 : i64, scratch_operands = 0 : i64, tpu.core_type = #tpu.core_type<tc>, window_params = [{transform_indices = @transform_0, window_bounds = array<i64: 8, 128>}, {transform_indices = @transform_1, window_bounds = array<i64: 8, 128>}]} {
    %c0 = arith.constant 0 : index
    %c0_0 = arith.constant 0 : index
    %0 = vector.load %arg2[%c0, %c0_0] : memref<8x128xf32, #tpu.memory_space<vmem>>, vector<8x128xf32>
    %c0_1 = arith.constant 0 : index
    %1 = memref.load %arg1[%c0_1] : memref<22xf32, #tpu.memory_space<smem>>
    %2 = vector.broadcast %1 : f32 to vector<8x128xf32>
    %3 = arith.mulf %0, %2 : vector<8x128xf32>
    %c1 = arith.constant 1 : index
    %4 = memref.load %arg1[%c1] : memref<22xf32, #tpu.memory_space<smem>>
    %5 = vector.broadcast %4 : f32 to vector<8x128xf32>
    %6 = arith.addf %3, %5 : vector<8x128xf32>
    %c12 = arith.constant 12 : index
    %7 = memref.load %arg1[%c12] : memref<22xf32, #tpu.memory_space<smem>>
    %c2 = arith.constant 2 : index
    %8 = memref.load %arg1[%c2] : memref<22xf32, #tpu.memory_space<smem>>
    %9 = vector.broadcast %8 : f32 to vector<8x128xf32>
    %10 = arith.subf %0, %9 : vector<8x128xf32>
    %11 = math.absf %10 : vector<8x128xf32>
    %12 = vector.broadcast %7 : f32 to vector<8x128xf32>
    %13 = arith.mulf %12, %11 : vector<8x128xf32>
    %14 = arith.addf %6, %13 : vector<8x128xf32>
    %c13 = arith.constant 13 : index
    %15 = memref.load %arg1[%c13] : memref<22xf32, #tpu.memory_space<smem>>
    %c3 = arith.constant 3 : index
    %16 = memref.load %arg1[%c3] : memref<22xf32, #tpu.memory_space<smem>>
    %17 = vector.broadcast %16 : f32 to vector<8x128xf32>
    %18 = arith.subf %0, %17 : vector<8x128xf32>
    %19 = math.absf %18 : vector<8x128xf32>
    %20 = vector.broadcast %15 : f32 to vector<8x128xf32>
    %21 = arith.mulf %20, %19 : vector<8x128xf32>
    %22 = arith.addf %14, %21 : vector<8x128xf32>
    %c14 = arith.constant 14 : index
    %23 = memref.load %arg1[%c14] : memref<22xf32, #tpu.memory_space<smem>>
    %c4 = arith.constant 4 : index
    %24 = memref.load %arg1[%c4] : memref<22xf32, #tpu.memory_space<smem>>
    %25 = vector.broadcast %24 : f32 to vector<8x128xf32>
    %26 = arith.subf %0, %25 : vector<8x128xf32>
    %27 = math.absf %26 : vector<8x128xf32>
    %28 = vector.broadcast %23 : f32 to vector<8x128xf32>
    %29 = arith.mulf %28, %27 : vector<8x128xf32>
    %30 = arith.addf %22, %29 : vector<8x128xf32>
    %c15 = arith.constant 15 : index
    %31 = memref.load %arg1[%c15] : memref<22xf32, #tpu.memory_space<smem>>
    %c5 = arith.constant 5 : index
    %32 = memref.load %arg1[%c5] : memref<22xf32, #tpu.memory_space<smem>>
    %33 = vector.broadcast %32 : f32 to vector<8x128xf32>
    %34 = arith.subf %0, %33 : vector<8x128xf32>
    %35 = math.absf %34 : vector<8x128xf32>
    %36 = vector.broadcast %31 : f32 to vector<8x128xf32>
    %37 = arith.mulf %36, %35 : vector<8x128xf32>
    %38 = arith.addf %30, %37 : vector<8x128xf32>
    %c16 = arith.constant 16 : index
    %39 = memref.load %arg1[%c16] : memref<22xf32, #tpu.memory_space<smem>>
    %c6 = arith.constant 6 : index
    %40 = memref.load %arg1[%c6] : memref<22xf32, #tpu.memory_space<smem>>
    %41 = vector.broadcast %40 : f32 to vector<8x128xf32>
    %42 = arith.subf %0, %41 : vector<8x128xf32>
    %43 = math.absf %42 : vector<8x128xf32>
    %44 = vector.broadcast %39 : f32 to vector<8x128xf32>
    %45 = arith.mulf %44, %43 : vector<8x128xf32>
    %46 = arith.addf %38, %45 : vector<8x128xf32>
    %c17 = arith.constant 17 : index
    %47 = memref.load %arg1[%c17] : memref<22xf32, #tpu.memory_space<smem>>
    %c7 = arith.constant 7 : index
    %48 = memref.load %arg1[%c7] : memref<22xf32, #tpu.memory_space<smem>>
    %49 = vector.broadcast %48 : f32 to vector<8x128xf32>
    %50 = arith.subf %0, %49 : vector<8x128xf32>
    %51 = math.absf %50 : vector<8x128xf32>
    %52 = vector.broadcast %47 : f32 to vector<8x128xf32>
    %53 = arith.mulf %52, %51 : vector<8x128xf32>
    %54 = arith.addf %46, %53 : vector<8x128xf32>
    %c18 = arith.constant 18 : index
    %55 = memref.load %arg1[%c18] : memref<22xf32, #tpu.memory_space<smem>>
    %c8 = arith.constant 8 : index
    %56 = memref.load %arg1[%c8] : memref<22xf32, #tpu.memory_space<smem>>
    %57 = vector.broadcast %56 : f32 to vector<8x128xf32>
    %58 = arith.subf %0, %57 : vector<8x128xf32>
    %59 = math.absf %58 : vector<8x128xf32>
    %60 = vector.broadcast %55 : f32 to vector<8x128xf32>
    %61 = arith.mulf %60, %59 : vector<8x128xf32>
    %62 = arith.addf %54, %61 : vector<8x128xf32>
    %c19 = arith.constant 19 : index
    %63 = memref.load %arg1[%c19] : memref<22xf32, #tpu.memory_space<smem>>
    %c9 = arith.constant 9 : index
    %64 = memref.load %arg1[%c9] : memref<22xf32, #tpu.memory_space<smem>>
    %65 = vector.broadcast %64 : f32 to vector<8x128xf32>
    %66 = arith.subf %0, %65 : vector<8x128xf32>
    %67 = math.absf %66 : vector<8x128xf32>
    %68 = vector.broadcast %63 : f32 to vector<8x128xf32>
    %69 = arith.mulf %68, %67 : vector<8x128xf32>
    %70 = arith.addf %62, %69 : vector<8x128xf32>
    %c20 = arith.constant 20 : index
    %71 = memref.load %arg1[%c20] : memref<22xf32, #tpu.memory_space<smem>>
    %c10 = arith.constant 10 : index
    %72 = memref.load %arg1[%c10] : memref<22xf32, #tpu.memory_space<smem>>
    %73 = vector.broadcast %72 : f32 to vector<8x128xf32>
    %74 = arith.subf %0, %73 : vector<8x128xf32>
    %75 = math.absf %74 : vector<8x128xf32>
    %76 = vector.broadcast %71 : f32 to vector<8x128xf32>
    %77 = arith.mulf %76, %75 : vector<8x128xf32>
    %78 = arith.addf %70, %77 : vector<8x128xf32>
    %c21 = arith.constant 21 : index
    %79 = memref.load %arg1[%c21] : memref<22xf32, #tpu.memory_space<smem>>
    %c11 = arith.constant 11 : index
    %80 = memref.load %arg1[%c11] : memref<22xf32, #tpu.memory_space<smem>>
    %81 = vector.broadcast %80 : f32 to vector<8x128xf32>
    %82 = arith.subf %0, %81 : vector<8x128xf32>
    %83 = math.absf %82 : vector<8x128xf32>
    %84 = vector.broadcast %79 : f32 to vector<8x128xf32>
    %85 = arith.mulf %84, %83 : vector<8x128xf32>
    %86 = arith.addf %78, %85 : vector<8x128xf32>
    %c0_2 = arith.constant 0 : index
    %c0_3 = arith.constant 0 : index
    %87 = vector.load %arg3[%c0_2, %c0_3] : memref<8x128xf32, #tpu.memory_space<vmem>>, vector<8x128xf32>
    tpu.vector_store %arg3[%c0_2, %c0_3], %86 {strides = array<i32>} : memref<8x128xf32, #tpu.memory_space<vmem>>, vector<8x128xf32>,
    return
  }
  func.func @transform_0(%arg0: i32, %arg1: memref<22xf32, #tpu.memory_space<smem>>) -> (i32, i32) {
    %c0_i32 = arith.constant 0 : i32
    %c0_i32_0 = arith.constant 0 : i32
    return %arg0, %c0_i32 : i32, i32
  }
  func.func @transform_1(%arg0: i32, %arg1: memref<22xf32, #tpu.memory_space<smem>>) -> (i32, i32) {
    %c0_i32 = arith.constant 0 : i32
    %c0_i32_0 = arith.constant 0 : i32
    return %arg0, %c0_i32 : i32, i32
  }
}

</mosaic_0001>

<bundles_post_ra>
// kernel: net_forward_packed.1
= control target key start
LH: loop header
LB: loop body
LE: loop exit
PB: predicated region body
PF: predicated region fallthrough
CT: control target
= control target key end

     0   :  { %s253_s0 = inlined_call_operand.vmem [shape: f32[22], index: 0, kind: input, shape index: {}]   ;;  %s254_s1 = inlined_call_operand.vmem [shape: f32[8,128], index: 1, kind: input, shape index: {}]   ;;  %s255_s2 = inlined_call_operand.hbm [shape: f32[8,128], index: 2, kind: output, shape index: {}]  }
   0x1   :  { %s7_s11 = sshll.u32 %s253_s0, 4  ;;  %s8_s11 = int_to_ptr.vmem [resolvable:$true] %s7_s11 }
   0x2   :  { %s141_s12 = scalar_lea.vmem %s8_s11, 16  ;;  %p146_p1 = scmp.lt.s32.totalorder %s8_s11, %s8_s11 }
   0x3   :  { %p142_p0 = scmp.ne.s32.totalorder %s8_s11, %s141_s12  ;;  %p147_p2 = scmp.lt.s32.totalorder %s141_s12, %s141_s12 }
   0x5   :  { %p148_p3 = por %p147_p2, %p146_p1 }
   0x7   :  { %p149_p4 = pnand %p148_p3, %p142_p0 }
   0x9   :  { %152 = shalt.err (!%p149_p4)  }
   0xa   :  { %s179_s13 = smov [#allocation3]  }
   0xb   :  { %10 = dma.vmem_to_smem %s8_s11, 16, %s179_s13, [#allocation2] }
   0xc   :  { %175 = dma.done.wait [#allocation2], 16 }
   0xd   :  { %176 = vsyncadd [#allocation2], 4294967280 }
   0xe   :  { %12 = sfence }
   0xf   :  { %s17_s14 = sld [smem:[#allocation3]]  ;;  %s118_s15 = sld [smem:[#allocation3 + $0x1]] }
  0x10   :  { %s199_s16 = sld [smem:[#allocation3 + $0xc]]  ;;  %s120_s17 = sld [smem:[#allocation3 + $0x2]] }
  0x11   :  { %13 = vsyncpa [#allocation5], 0  ;;  %s201_s0 = sld [smem:[#allocation3 + $0xd]]  ;;  %s122_s18 = sld [smem:[#allocation3 + $0x3]]  ;;  %v16_v0 = vld [vmem:[%s254_s1] sm:$0xff] }
  0x12   :  { %s203_s19 = sld [smem:[#allocation3 + $0xe]]  ;;  %s124_s20 = sld [smem:[#allocation3 + $0x4]] }
  0x13   :  { %s205_s21 = sld [smem:[#allocation3 + $0xf]]  ;;  %s126_s22 = sld [smem:[#allocation3 + $0x5]] }
  0x14   :  { %s210_s25 = sld [smem:[#allocation3 + $0x10]]  ;;  %s128_s26 = sld [smem:[#allocation3 + $0x6]] }
  0x15   :  { %v18_v1 = vstv %s17_s14  ;;  %v21_v2 = vstv %s118_s15  ;;  %s212_s27 = sld [smem:[#allocation3 + $0x7]]  ;;  %s214_s28 = sld [smem:[#allocation3 + $0x8]] }
  0x16   :  { %v19_v3 = vmul.f32 %v18_v1, %v16_v0  ;;  %v25_v4 = vstv %s120_s17  ;;  %v28_v6 = vstv %s199_s16  ;;  %s217_s29 = sld [smem:[#allocation3 + $0x9]]  ;;  %s222_s30 = sld [smem:[#allocation3 + $0xa]] }
  0x17   :  { %v26_v5 = vsub.f32 %v16_v0, %v25_v4  ;;  %v33_v7 = vstv %s122_s18  ;;  %v36_v10 = vstv %s201_s0  ;;  %s220_s1 = sld [smem:[#allocation3 + $0x11]]  ;;  %s225_s3 = sld [smem:[#allocation3 + $0xb]] }
  0x18   :  { %v22_v8 = vadd.f32 %v21_v2, %v19_v3  ;;  %v34_v9 = vsub.f32 %v16_v0, %v33_v7  ;;  %v41_v11 = vstv %s124_s20  ;;  %v44_v14 = vstv %s203_s19  ;;  %s228_s4 = sld [smem:[#allocation3 + $0x12]]  ;;  %s232_s5 = sld [smem:[#allocation3 + $0x13]] }
  0x19   :  { %v27_v12 = vand.u32 2147483647, %v26_v5  ;;  %v42_v13 = vsub.f32 %v16_v0, %v41_v11  ;;  %v49_v15 = vstv %s126_s22  ;;  %v52_v18 = vstv %s205_s21  ;;  %s135_s6 = sld [smem:[#allocation3 + $0x14]]  ;;  %s137_s7 = sld [smem:[#allocation3 + $0x15]] }
  0x1a   :  { %v35_v16 = vand.u32 2147483647, %v34_v9  ;;  %v50_v17 = vsub.f32 %v16_v0, %v49_v15  ;;  %v57_v19 = vstv %s128_s26  ;;  %v60_v26 = vstv %s210_s25  ;;  %s180_s8 = smov [#allocation4]  }
  0x1b   :  { %v29_v20 = vmul.f32 %v28_v6, %v27_v12  ;;  %v43_v21 = vand.u32 2147483647, %v42_v13  ;;  %v58_v22 = vsub.f32 %v16_v0, %v57_v19  ;;  %v65_v23 = vstv %s212_s27  ;;  %s110_s9 = sshll.u32 %s180_s8, 4  ;;  %s111_s9 = int_to_ptr.vmem [resolvable:$true] %s110_s9 }
  0x1c   :  { %v37_v24 = vmul.f32 %v36_v10, %v35_v16  ;;  %v51_v25 = vand.u32 2147483647, %v50_v17  ;;  %v66_v27 = vsub.f32 %v16_v0, %v65_v23  ;;  %v73_v31 = vstv %s214_s28  ;;  %s153_s10 = scalar_lea.vmem %s111_s9, 128  ;;  %p158_p6 = scmp.lt.s32.totalorder %s111_s9, %s111_s9 }
  0x1d   :  { %v30_v28 = vadd.f32 %v29_v20, %v22_v8  ;;  %v45_v29 = vmul.f32 %v44_v14, %v43_v21  ;;  %v59_v30 = vand.u32 2147483647, %v58_v22  ;;  %v74_v32 = vsub.f32 %v16_v0, %v73_v31  ;;  %p154_p5 = scmp.ne.s32.totalorder %s111_s9, %s153_s10  ;;  %p159_p7 = scmp.lt.s32.totalorder %s153_s10, %s153_s10 }
  0x1e   :  { %v53_v34 = vmul.f32 %v52_v18, %v51_v25  ;;  %v67_v35 = vand.u32 2147483647, %v66_v27  ;;  %v81_v36 = vstv %s217_s29  ;;  %v68_v38 = vstv %s220_s1 }
  0x1f   :  { %v38_v33 = vadd.f32 %v37_v24, %v30_v28  ;;  %v61_v37 = vmul.f32 %v60_v26, %v59_v30  ;;  %v82_v39 = vsub.f32 %v16_v0, %v81_v36  ;;  %v89_v40 = vstv %s222_s30  ;;  %p160_p8 = por %p159_p7, %p158_p6 }
  0x20   :  { %v75_v42 = vand.u32 2147483647, %v74_v32  ;;  %v90_v43 = vsub.f32 %v16_v0, %v89_v40  ;;  %v97_v44 = vstv %s225_s3  ;;  %v76_v45 = vstv %s228_s4 }
  0x21   :  { %v46_v41 = vadd.f32 %v45_v29, %v38_v33  ;;  %v69_v47 = vmul.f32 %v68_v38, %v67_v35  ;;  %v83_v48 = vand.u32 2147483647, %v82_v39  ;;  %v98_v49 = vsub.f32 %v16_v0, %v97_v44  ;;  %p161_p9 = pnand %p160_p8, %p154_p5 }
  0x22   :  { %v84_v50 = vstv %s232_s5  ;;  %v77_v52 = vmul.f32 %v76_v45, %v75_v42  ;;  %v91_v53 = vand.u32 2147483647, %v90_v43  ;;  %v92_v54 = vstv %s135_s6 }
  0x23   :  { %v54_v46 = vadd.f32 %v53_v34, %v46_v41  ;;  %v85_v56 = vmul.f32 %v84_v50, %v83_v48  ;;  %v99_v57 = vand.u32 2147483647, %v98_v49  ;;  %v100_v58 = vstv %s137_s7 }
  0x24   :  { %v93_v60 = vmul.f32 %v92_v54, %v91_v53 }
  0x25   :  { %v62_v51 = vadd.f32 %v61_v37, %v54_v46  ;;  %v101_v62 = vmul.f32 %v100_v58, %v99_v57 }
  0x27   :  { %v70_v55 = vadd.f32 %v69_v47, %v62_v51 }
  0x29   :  { %v78_v59 = vadd.f32 %v77_v52, %v70_v55 }
  0x2b   :  { %v86_v61 = vadd.f32 %v85_v56, %v78_v59 }
  0x2d   :  { %v94_v63 = vadd.f32 %v93_v60, %v86_v61 }
  0x2f   :  { %v102_v1 = vadd.f32 %v101_v62, %v94_v63 }
  0x31   :  { %103 = vst [vmem:[#allocation4] sm:$0xff] %v102_v1 }
  0x32   :  { %164 = shalt.err (!%p161_p9)
}
  0x33   :  { %s165_s13 = scalar_lea.hbm %s255_s2, 128 }
  0x34   :  { %p166_p10 = scmp.ne.s32.totalorder %s255_s2, %s165_s13  ;;  %p169_p11 = scmp.lt.u32.totalorder %s165_s13, %s255_s2 }
  0x36   :  { %p171_p12 = pnand %p169_p11, %p166_p10 }
  0x38   :  { %174 = shalt.err (!%p171_p12)
}
  0x39   :  { %113 = dma.vmem_to_hbm [thread:$0]  %s111_s9, 128, %s255_s2, [#allocation5]  }
  0x3a   :  { %177 = dma.done.wait [#allocation5], 128  }
  0x3b   :  { %178 = vsyncadd [#allocation5], 4294967168 }
  0x3c   :  { %117 = vsyncpa [#allocation5], 1 }

</bundles_post_ra>
